<compile_context>
chip_gen: v7x
topology: tpu7x:2x2x1
jax: 0.10.0
libtpu: 0.0.40
codegen_flags: <defaults>
</compile_context>

<pallas_src>
import numpy as np
import jax
import jax.numpy as jnp
from jax.experimental import pallas as pl
from jax.experimental.pallas import tpu as pltpu

# Hyperparameters (the hp dict of _CNNLSTM), small synthetic sizes.
B = 8            # batch (fills the 8-sublane vreg dimension)
L = 16           # raw sequence length
K = 3            # hp['kernel_size']  (odd -> symmetric 'same' padding)
C = 8            # hp['conv_filters']
P = 2            # hp['pool_size']
T = L // P       # time steps after MaxPool1d
H = 32           # hp['lstm_units']
D = 16           # hp['dense_units']

G = 4 * H        # gate width = 128 = one vreg of lanes
TB = T * B       # pooled rows
N = P * TB       # conv rows, ordered p*T*B + t*B + b  (= 128)

# Row layout of the packed "small" (8, G) parameter buffer.
_R_BL = 0            # LSTM bias (b_ih + b_hh), full 4H row
_R_B1 = 1            # fc1 bias, lanes [0, D)
_R_W2 = 2            # out-layer weight (D,) as a row, lanes [0, D)
_R_B2 = 3            # out-layer bias, replicated across all 128 lanes
_R_WC = 4            # K conv-tap rows, lanes [0, C)
_R_BC = _R_WC + K    # conv bias, lanes [0, C)
assert _R_BC <= 7


def _cnn_lstm_kernel(xg_ref, wbig_ref, small_ref, y_ref):
    f32 = jnp.float32
    bf16 = jnp.bfloat16

    # ---- hoisted parameter reads (no re-materialized broadcasts inside loops) ----
    wc = small_ref[_R_WC:_R_WC + K, 0:C]        # (K, C) conv taps
    bc = small_ref[_R_BC:_R_BC + 1, 0:C]        # (1, C) conv bias
    bl = small_ref[_R_BL:_R_BL + 1, :]          # (1, G) lstm bias
    b1 = small_ref[_R_B1:_R_B1 + 1, :]          # (1, G) fc1 bias (lanes [D:) == 0)
    w2 = small_ref[_R_W2:_R_W2 + 1, :]          # (1, G) out weight (lanes [D:) == 0)
    b2 = small_ref[_R_B2:_R_B2 + 1, :]          # (1, G) out bias replicated

    # ---- Conv1d(padding='same') + ReLU as one tiny dot on the lane-dense operand ----
    conv = jnp.maximum(
        jnp.dot(xg_ref[...], wc, preferred_element_type=f32) + bc, 0.0)   # (N, C)

    # ---- MaxPool1d(kernel=P, stride=P): max over the p row-blocks ----
    pooled = conv[0:TB, :]
    for p in range(1, P):
        pooled = jnp.maximum(pooled, conv[p * TB:(p + 1) * TB, :])        # (T*B, C)

    # ---- LSTM input projection hoisted out of the time loop (one bf16 MXU push) ----
    wih = wbig_ref[0:C, :].astype(bf16)                                   # (C, 4H)
    gx = jnp.dot(pooled.astype(bf16), wih,
                 preferred_element_type=f32) + bl                         # (T*B, 4H)

    # ---- LSTM recurrence (PyTorch gate order i, f, g, o along the 4H lanes) ----
    # h / c live in the full 128-lane layout; only lanes [0, H) are meaningful. The
    # remaining lanes are bounded don't-cares that contribute exactly 0 through the
    # zero-padded rows of whh / w1 (zeros stay exact in bf16).
    whh = wbig_ref[C:C + G, :].astype(bf16)                               # (4H, 4H), rows [H:) zero
    h = jnp.zeros((B, G), f32)
    c = jnp.zeros((B, G), f32)
    for t in range(T):   # T = 8: small static unroll (use lax.fori_loop for larger T)
        gates = gx[t * B:(t + 1) * B, :] + jnp.dot(
            h.astype(bf16), whh, preferred_element_type=f32)
        sg = jax.nn.sigmoid(gates)                      # full-vreg EUP
        th = jnp.tanh(gates)                            # full-vreg EUP
        f_g = pltpu.roll(sg, shift=3 * H, axis=1)       # f -> lanes [0, H)   (XLU)
        g_g = pltpu.roll(th, shift=2 * H, axis=1)       # g -> lanes [0, H)   (XLU)
        o_g = pltpu.roll(sg, shift=H, axis=1)           # o -> lanes [0, H)   (XLU)
        c = f_g * c + sg * g_g                          # i is already at lanes [0, H)
        h = o_g * jnp.tanh(c)

    # ---- fc1 + ReLU (dropout is identity in eval mode) ----
    w1 = wbig_ref[C + G:C + 2 * G, :].astype(bf16)                        # (4H, 4H), zero-padded
    z = jnp.maximum(jnp.dot(h.astype(bf16), w1,
                            preferred_element_type=f32) + b1, 0.0)        # (B, 4H), lanes [D:) == 0
    # TODO(synk): nn.Dropout is a no-op at inference; training-mode stochastic dropout not implemented.

    # ---- output head: multiply + lane reduce (a width-1 output is not MXU work) ----
    logit = jnp.sum(z * w2, axis=-1, keepdims=True)                       # (B, 1)
    # Lane-dense store: prediction broadcast across all 128 lanes (unmasked vst).
    y_ref[...] = jax.nn.sigmoid(logit + b2)                               # (B, 4H)


def _pack_params(p):
    """Pack the model parameters into two VMEM-friendly buffers (fewer DMAs)."""
    whh_p = jnp.zeros((G, G), jnp.float32).at[0:H, :].set(p['whh'])       # zero rows kill junk lanes of h
    w1_p = jnp.zeros((G, G), jnp.float32).at[0:H, 0:D].set(p['w1'])
    wbig = jnp.concatenate([p['wih'], whh_p, w1_p], axis=0)               # (C + 2*4H, 4H) f32, 8-row aligned

    small = jnp.zeros((8, G), jnp.float32)
    small = small.at[_R_BL, :].set(p['bl'][0])
    small = small.at[_R_B1, 0:D].set(p['b1'][0])
    small = small.at[_R_W2, 0:D].set(p['w2'][:, 0])
    small = small.at[_R_B2, :].set(p['b2'][0, 0])
    small = small.at[_R_WC:_R_WC + K, 0:C].set(p['wc'])
    small = small.at[_R_BC, 0:C].set(p['bc'][0])
    return wbig, small


def cnn_lstm_forward(x, params):
    # Glue (plain JAX, layout plumbing only): K shifted views of the raw input arranged as a
    # lane-dense (N, K) operand, rows ordered p*T*B + t*B + b so pooling / time slicing in the
    # kernel are plain row-block ops.  No channel replication (was 16x redundant data).
    pad = (K - 1) // 2
    xp = jnp.pad(x, ((0, 0), (pad, pad)))                                 # (B, L+K-1)
    xsh = jnp.stack([xp[:, k:k + L] for k in range(K)], axis=-1)          # (B, L, K)
    xg = xsh.reshape(B, T, P, K).transpose(2, 1, 0, 3).reshape(N, K)      # (P*T*B, K)

    wbig, small = _pack_params(params)

    y_full = pl.pallas_call(
        _cnn_lstm_kernel,
        out_shape=jax.ShapeDtypeStruct((B, G), jnp.float32),
        in_specs=[pl.BlockSpec(memory_space=pltpu.MemorySpace.VMEM)] * 3,
        out_specs=pl.BlockSpec(memory_space=pltpu.MemorySpace.VMEM),
    )(xg, wbig, small)
    return y_full[:, :1]                                                  # (B, 1)


def init_params(key):
    ks = jax.random.split(key, 9)
    s = 0.1
    return dict(
        wc=s * jax.random.normal(ks[0], (K, C), jnp.float32),      # Conv1d weight (C,1,K) transposed to (K,C)
        bc=s * jax.random.normal(ks[1], (1, C), jnp.float32),      # Conv1d bias
        wih=s * jax.random.normal(ks[2], (C, 4 * H), jnp.float32), # LSTM weight_ih_l0^T, gate order i,f,g,o
        whh=s * jax.random.normal(ks[3], (H, 4 * H), jnp.float32), # LSTM weight_hh_l0^T
        bl=s * jax.random.normal(ks[4], (1, 4 * H), jnp.float32),  # bias_ih + bias_hh combined
        w1=s * jax.random.normal(ks[5], (H, D), jnp.float32),      # fc1 weight^T
        b1=s * jax.random.normal(ks[6], (1, D), jnp.float32),
        w2=s * jax.random.normal(ks[7], (D, 1), jnp.float32),      # out weight^T
        b2=s * jax.random.normal(ks[8], (1, 1), jnp.float32),
    )


def ref_forward(x, p):
    # Pure-JAX f32 reference mirroring the PyTorch semantics (uses the unpacked params).
    pad = (K - 1) // 2
    xp = jnp.pad(x, ((0, 0), (pad, pad)))
    conv = jnp.stack([xp[:, k:k + L] for k in range(K)], axis=-1) @ p['wc'] + p['bc']  # (B, L, C)
    conv = jax.nn.relu(conv)
    pooled = conv.reshape(B, T, P, C).max(axis=2)                                      # (B, T, C)
    h = jnp.zeros((B, H), jnp.float32)
    c = jnp.zeros((B, H), jnp.float32)
    for t in range(T):
        gates = pooled[:, t, :] @ p['wih'] + h @ p['whh'] + p['bl']
        i_g = jax.nn.sigmoid(gates[:, 0:H])
        f_g = jax.nn.sigmoid(gates[:, H:2 * H])
        g_g = jnp.tanh(gates[:, 2 * H:3 * H])
        o_g = jax.nn.sigmoid(gates[:, 3 * H:4 * H])
        c = f_g * c + i_g * g_g
        h = o_g * jnp.tanh(c)
    z = jax.nn.relu(h @ p['w1'] + p['b1'])
    return jax.nn.sigmoid(z @ p['w2'] + p['b2'])


if __name__ == "__main__":
    key = jax.random.PRNGKey(0)
    kx, kp = jax.random.split(key)
    x = jax.random.normal(kx, (B, L), jnp.float32)
    params = init_params(kp)

    y = cnn_lstm_forward(x, params)
    y = jax.block_until_ready(y)

    y_ref = ref_forward(x, params)
    assert y.shape == (B, 1)
    # bf16 MXU operands on the T=8 recurrence -> slightly looser tolerance than pure f32.
    np.testing.assert_allclose(np.asarray(y), np.asarray(y_ref), rtol=1e-2, atol=2e-3)
    print("KERNEL_OK")
</pallas_src>

<mosaic_0001>
module attributes {stable_mosaic.version = 11 : i64} {
  func.func @_cnn_lstm_kernel(%arg0: memref<128x3xf32, #tpu.memory_space<vmem>>, %arg1: memref<264x128xf32, #tpu.memory_space<vmem>>, %arg2: memref<8x128xf32, #tpu.memory_space<vmem>>, %arg3: memref<8x128xf32, #tpu.memory_space<vmem>>) attributes {dimension_semantics = [], scalar_prefetch = 0 : i64, scratch_operands = 0 : i64, tpu.core_type = #tpu.core_type<tc>} {
    %c4 = arith.constant 4 : index
    %c0 = arith.constant 0 : index
    %0 = vector.load %arg2[%c4, %c0] : memref<8x128xf32, #tpu.memory_space<vmem>>, vector<3x8xf32>
    %c7 = arith.constant 7 : index
    %c0_0 = arith.constant 0 : index
    %1 = vector.load %arg2[%c7, %c0_0] : memref<8x128xf32, #tpu.memory_space<vmem>>, vector<1x8xf32>
    %c0_1 = arith.constant 0 : index
    %c0_2 = arith.constant 0 : index
    %2 = vector.load %arg2[%c0_1, %c0_2] : memref<8x128xf32, #tpu.memory_space<vmem>>, vector<1x128xf32>
    %c1 = arith.constant 1 : index
    %c0_3 = arith.constant 0 : index
    %3 = vector.load %arg2[%c1, %c0_3] : memref<8x128xf32, #tpu.memory_space<vmem>>, vector<1x128xf32>
    %c2 = arith.constant 2 : index
    %c0_4 = arith.constant 0 : index
    %4 = vector.load %arg2[%c2, %c0_4] : memref<8x128xf32, #tpu.memory_space<vmem>>, vector<1x128xf32>
    %c3 = arith.constant 3 : index
    %c0_5 = arith.constant 0 : index
    %5 = vector.load %arg2[%c3, %c0_5] : memref<8x128xf32, #tpu.memory_space<vmem>>, vector<1x128xf32>
    %c0_6 = arith.constant 0 : index
    %c0_7 = arith.constant 0 : index
    %6 = vector.load %arg0[%c0_6, %c0_7] : memref<128x3xf32, #tpu.memory_space<vmem>>, vector<128x3xf32>
    %cst = arith.constant dense<0.000000e+00> : vector<128x8xf32>
    %7 = tpu.matmul %6, %0, %cst {dimension_numbers = #tpu.dot_dimension_numbers<[1], [0], [0], [1], [0, 0, 1, 1], [], []>} : vector<128x3xf32>, vector<3x8xf32>, vector<128x8xf32> -> vector<128x8xf32>
    %8 = vector.broadcast %1 : vector<1x8xf32> to vector<128x8xf32>
    %9 = arith.addf %7, %8 : vector<128x8xf32>
    %cst_8 = arith.constant 0.000000e+00 : f32
    %10 = vector.broadcast %cst_8 : f32 to vector<128x8xf32>
    %11 = arith.maximumf %9, %10 : vector<128x8xf32>
    %12 = vector.extract_strided_slice %11 {offsets = [0, 0], sizes = [64, 8], strides = [1, 1]} : vector<128x8xf32> to vector<64x8xf32>
    %13 = vector.extract_strided_slice %11 {offsets = [64, 0], sizes = [64, 8], strides = [1, 1]} : vector<128x8xf32> to vector<64x8xf32>
    %14 = arith.maximumf %12, %13 : vector<64x8xf32>
    %c0_9 = arith.constant 0 : index
    %c0_10 = arith.constant 0 : index
    %15 = vector.load %arg1[%c0_9, %c0_10] : memref<264x128xf32, #tpu.memory_space<vmem>>, vector<8x128xf32>
    %16 = arith.truncf %15 : vector<8x128xf32> to vector<8x128xbf16>
    %17 = arith.truncf %14 : vector<64x8xf32> to vector<64x8xbf16>
    %cst_11 = arith.constant dense<0.000000e+00> : vector<64x128xf32>
    %18 = tpu.matmul %17, %16, %cst_11 {dimension_numbers = #tpu.dot_dimension_numbers<[1], [0], [0], [1], [0, 0, 1, 1], [], []>} : vector<64x8xbf16>, vector<8x128xbf16>, vector<64x128xf32> -> vector<64x128xf32>
    %19 = vector.broadcast %2 : vector<1x128xf32> to vector<64x128xf32>
    %20 = arith.addf %18, %19 : vector<64x128xf32>
    %c8 = arith.constant 8 : index
    %c0_12 = arith.constant 0 : index
    %21 = vector.load %arg1[%c8, %c0_12] : memref<264x128xf32, #tpu.memory_space<vmem>>, vector<128x128xf32>
    %22 = arith.truncf %21 : vector<128x128xf32> to vector<128x128xbf16>
    %cst_13 = arith.constant 0.000000e+00 : f32
    %23 = vector.broadcast %cst_13 : f32 to vector<8x128xf32>
    %cst_14 = arith.constant 0.000000e+00 : f32
    %24 = vector.broadcast %cst_14 : f32 to vector<8x128xf32>
    %25 = vector.extract_strided_slice %20 {offsets = [0, 0], sizes = [8, 128], strides = [1, 1]} : vector<64x128xf32> to vector<8x128xf32>
    %26 = arith.truncf %23 : vector<8x128xf32> to vector<8x128xbf16>
    %cst_15 = arith.constant dense<0.000000e+00> : vector<8x128xf32>
    %27 = tpu.matmul %26, %22, %cst_15 {dimension_numbers = #tpu.dot_dimension_numbers<[1], [0], [0], [1], [0, 0, 1, 1], [], []>} : vector<8x128xbf16>, vector<128x128xbf16>, vector<8x128xf32> -> vector<8x128xf32>
    %28 = arith.addf %25, %27 : vector<8x128xf32>
    %29 = arith.negf %28 : vector<8x128xf32>
    %30 = math.exp %29 : vector<8x128xf32>
    %cst_16 = arith.constant 1.000000e+00 : f32
    %31 = vector.broadcast %cst_16 : f32 to vector<8x128xf32>
    %32 = arith.addf %31, %30 : vector<8x128xf32>
    %33 = arith.divf %31, %32 : vector<8x128xf32>
    %34 = math.tanh %28 : vector<8x128xf32>
    %c96_i32 = arith.constant 96 : i32
    %35 = tpu.dynamic_rotate %33 by %c96_i32 dim 1 : vector<8x128xf32>, i32 -> vector<8x128xf32>
    %c64_i32 = arith.constant 64 : i32
    %36 = tpu.dynamic_rotate %34 by %c64_i32 dim 1 : vector<8x128xf32>, i32 -> vector<8x128xf32>
    %c32_i32 = arith.constant 32 : i32
    %37 = tpu.dynamic_rotate %33 by %c32_i32 dim 1 : vector<8x128xf32>, i32 -> vector<8x128xf32>
    %38 = arith.mulf %35, %24 : vector<8x128xf32>
    %39 = arith.mulf %33, %36 : vector<8x128xf32>
    %40 = arith.addf %38, %39 : vector<8x128xf32>
    %41 = math.tanh %40 : vector<8x128xf32>
    %42 = arith.mulf %37, %41 : vector<8x128xf32>
    %43 = vector.extract_strided_slice %20 {offsets = [8, 0], sizes = [8, 128], strides = [1, 1]} : vector<64x128xf32> to vector<8x128xf32>
    %44 = arith.truncf %42 : vector<8x128xf32> to vector<8x128xbf16>
    %cst_17 = arith.constant dense<0.000000e+00> : vector<8x128xf32>
    %45 = tpu.matmul %44, %22, %cst_17 {dimension_numbers = #tpu.dot_dimension_numbers<[1], [0], [0], [1], [0, 0, 1, 1], [], []>} : vector<8x128xbf16>, vector<128x128xbf16>, vector<8x128xf32> -> vector<8x128xf32>
    %46 = arith.addf %43, %45 : vector<8x128xf32>
    %47 = arith.negf %46 : vector<8x128xf32>
    %48 = math.exp %47 : vector<8x128xf32>
    %cst_18 = arith.constant 1.000000e+00 : f32
    %49 = vector.broadcast %cst_18 : f32 to vector<8x128xf32>
    %50 = arith.addf %49, %48 : vector<8x128xf32>
    %51 = arith.divf %49, %50 : vector<8x128xf32>
    %52 = math.tanh %46 : vector<8x128xf32>
    %c96_i32_19 = arith.constant 96 : i32
    %53 = tpu.dynamic_rotate %51 by %c96_i32_19 dim 1 : vector<8x128xf32>, i32 -> vector<8x128xf32>
    %c64_i32_20 = arith.constant 64 : i32
    %54 = tpu.dynamic_rotate %52 by %c64_i32_20 dim 1 : vector<8x128xf32>, i32 -> vector<8x128xf32>
    %c32_i32_21 = arith.constant 32 : i32
    %55 = tpu.dynamic_rotate %51 by %c32_i32_21 dim 1 : vector<8x128xf32>, i32 -> vector<8x128xf32>
    %56 = arith.mulf %53, %40 : vector<8x128xf32>
    %57 = arith.mulf %51, %54 : vector<8x128xf32>
    %58 = arith.addf %56, %57 : vector<8x128xf32>
    %59 = math.tanh %58 : vector<8x128xf32>
    %60 = arith.mulf %55, %59 : vector<8x128xf32>
    %61 = vector.extract_strided_slice %20 {offsets = [16, 0], sizes = [8, 128], strides = [1, 1]} : vector<64x128xf32> to vector<8x128xf32>
    %62 = arith.truncf %60 : vector<8x128xf32> to vector<8x128xbf16>
    %cst_22 = arith.constant dense<0.000000e+00> : vector<8x128xf32>
    %63 = tpu.matmul %62, %22, %cst_22 {dimension_numbers = #tpu.dot_dimension_numbers<[1], [0], [0], [1], [0, 0, 1, 1], [], []>} : vector<8x128xbf16>, vector<128x128xbf16>, vector<8x128xf32> -> vector<8x128xf32>
    %64 = arith.addf %61, %63 : vector<8x128xf32>
    %65 = arith.negf %64 : vector<8x128xf32>
    %66 = math.exp %65 : vector<8x128xf32>
    %cst_23 = arith.constant 1.000000e+00 : f32
    %67 = vector.broadcast %cst_23 : f32 to vector<8x128xf32>
    %68 = arith.addf %67, %66 : vector<8x128xf32>
    %69 = arith.divf %67, %68 : vector<8x128xf32>
    %70 = math.tanh %64 : vector<8x128xf32>
    %c96_i32_24 = arith.constant 96 : i32
    %71 = tpu.dynamic_rotate %69 by %c96_i32_24 dim 1 : vector<8x128xf32>, i32 -> vector<8x128xf32>
    %c64_i32_25 = arith.constant 64 : i32
    %72 = tpu.dynamic_rotate %70 by %c64_i32_25 dim 1 : vector<8x128xf32>, i32 -> vector<8x128xf32>
    %c32_i32_26 = arith.constant 32 : i32
    %73 = tpu.dynamic_rotate %69 by %c32_i32_26 dim 1 : vector<8x128xf32>, i32 -> vector<8x128xf32>
    %74 = arith.mulf %71, %58 : vector<8x128xf32>
    %75 = arith.mulf %69, %72 : vector<8x128xf32>
    %76 = arith.addf %74, %75 : vector<8x128xf32>
    %77 = math.tanh %76 : vector<8x128xf32>
    %78 = arith.mulf %73, %77 : vector<8x128xf32>
    %79 = vector.extract_strided_slice %20 {offsets = [24, 0], sizes = [8, 128], strides = [1, 1]} : vector<64x128xf32> to vector<8x128xf32>
    %80 = arith.truncf %78 : vector<8x128xf32> to vector<8x128xbf16>
    %cst_27 = arith.constant dense<0.000000e+00> : vector<8x128xf32>
    %81 = tpu.matmul %80, %22, %cst_27 {dimension_numbers = #tpu.dot_dimension_numbers<[1], [0], [0], [1], [0, 0, 1, 1], [], []>} : vector<8x128xbf16>, vector<128x128xbf16>, vector<8x128xf32> -> vector<8x128xf32>
    %82 = arith.addf %79, %81 : vector<8x128xf32>
    %83 = arith.negf %82 : vector<8x128xf32>
    %84 = math.exp %83 : vector<8x128xf32>
    %cst_28 = arith.constant 1.000000e+00 : f32
    %85 = vector.broadcast %cst_28 : f32 to vector<8x128xf32>
    %86 = arith.addf %85, %84 : vector<8x128xf32>
    %87 = arith.divf %85, %86 : vector<8x128xf32>
    %88 = math.tanh %82 : vector<8x128xf32>
    %c96_i32_29 = arith.constant 96 : i32
    %89 = tpu.dynamic_rotate %87 by %c96_i32_29 dim 1 : vector<8x128xf32>, i32 -> vector<8x128xf32>
    %c64_i32_30 = arith.constant 64 : i32
    %90 = tpu.dynamic_rotate %88 by %c64_i32_30 dim 1 : vector<8x128xf32>, i32 -> vector<8x128xf32>
    %c32_i32_31 = arith.constant 32 : i32
    %91 = tpu.dynamic_rotate %87 by %c32_i32_31 dim 1 : vector<8x128xf32>, i32 -> vector<8x128xf32>
    %92 = arith.mulf %89, %76 : vector<8x128xf32>
    %93 = arith.mulf %87, %90 : vector<8x128xf32>
    %94 = arith.addf %92, %93 : vector<8x128xf32>
    %95 = math.tanh %94 : vector<8x128xf32>
    %96 = arith.mulf %91, %95 : vector<8x128xf32>
    %97 = vector.extract_strided_slice %20 {offsets = [32, 0], sizes = [8, 128], strides = [1, 1]} : vector<64x128xf32> to vector<8x128xf32>
    %98 = arith.truncf %96 : vector<8x128xf32> to vector<8x128xbf16>
    %cst_32 = arith.constant dense<0.000000e+00> : vector<8x128xf32>
    %99 = tpu.matmul %98, %22, %cst_32 {dimension_numbers = #tpu.dot_dimension_numbers<[1], [0], [0], [1], [0, 0, 1, 1], [], []>} : vector<8x128xbf16>, vector<128x128xbf16>, vector<8x128xf32> -> vector<8x128xf32>
    %100 = arith.addf %97, %99 : vector<8x128xf32>
    %101 = arith.negf %100 : vector<8x128xf32>
    %102 = math.exp %101 : vector<8x128xf32>
    %cst_33 = arith.constant 1.000000e+00 : f32
    %103 = vector.broadcast %cst_33 : f32 to vector<8x128xf32>
    %104 = arith.addf %103, %102 : vector<8x128xf32>
    %105 = arith.divf %103, %104 : vector<8x128xf32>
    %106 = math.tanh %100 : vector<8x128xf32>
    %c96_i32_34 = arith.constant 96 : i32
    %107 = tpu.dynamic_rotate %105 by %c96_i32_34 dim 1 : vector<8x128xf32>, i32 -> vector<8x128xf32>
    %c64_i32_35 = arith.constant 64 : i32
    %108 = tpu.dynamic_rotate %106 by %c64_i32_35 dim 1 : vector<8x128xf32>, i32 -> vector<8x128xf32>
    %c32_i32_36 = arith.constant 32 : i32
    %109 = tpu.dynamic_rotate %105 by %c32_i32_36 dim 1 : vector<8x128xf32>, i32 -> vector<8x128xf32>
    %110 = arith.mulf %107, %94 : vector<8x128xf32>
    %111 = arith.mulf %105, %108 : vector<8x128xf32>
    %112 = arith.addf %110, %111 : vector<8x128xf32>
    %113 = math.tanh %112 : vector<8x128xf32>
    %114 = arith.mulf %109, %113 : vector<8x128xf32>
    %115 = vector.extract_strided_slice %20 {offsets = [40, 0], sizes = [8, 128], strides = [1, 1]} : vector<64x128xf32> to vector<8x128xf32>
    %116 = arith.truncf %114 : vector<8x128xf32> to vector<8x128xbf16>
    %cst_37 = arith.constant dense<0.000000e+00> : vector<8x128xf32>
    %117 = tpu.matmul %116, %22, %cst_37 {dimension_numbers = #tpu.dot_dimension_numbers<[1], [0], [0], [1], [0, 0, 1, 1], [], []>} : vector<8x128xbf16>, vector<128x128xbf16>, vector<8x128xf32> -> vector<8x128xf32>
    %118 = arith.addf %115, %117 : vector<8x128xf32>
    %119 = arith.negf %118 : vector<8x128xf32>
    %120 = math.exp %119 : vector<8x128xf32>
    %cst_38 = arith.constant 1.000000e+00 : f32
    %121 = vector.broadcast %cst_38 : f32 to vector<8x128xf32>
    %122 = arith.addf %121, %120 : vector<8x128xf32>
    %123 = arith.divf %121, %122 : vector<8x128xf32>
    %124 = math.tanh %118 : vector<8x128xf32>
    %c96_i32_39 = arith.constant 96 : i32
    %125 = tpu.dynamic_rotate %123 by %c96_i32_39 dim 1 : vector<8x128xf32>, i32 -> vector<8x128xf32>
    %c64_i32_40 = arith.constant 64 : i32
    %126 = tpu.dynamic_rotate %124 by %c64_i32_40 dim 1 : vector<8x128xf32>, i32 -> vector<8x128xf32>
    %c32_i32_41 = arith.constant 32 : i32
    %127 = tpu.dynamic_rotate %123 by %c32_i32_41 dim 1 : vector<8x128xf32>, i32 -> vector<8x128xf32>
    %128 = arith.mulf %125, %112 : vector<8x128xf32>
    %129 = arith.mulf %123, %126 : vector<8x128xf32>
    %130 = arith.addf %128, %129 : vector<8x128xf32>
    %131 = math.tanh %130 : vector<8x128xf32>
    %132 = arith.mulf %127, %131 : vector<8x128xf32>
    %133 = vector.extract_strided_slice %20 {offsets = [48, 0], sizes = [8, 128], strides = [1, 1]} : vector<64x128xf32> to vector<8x128xf32>
    %134 = arith.truncf %132 : vector<8x128xf32> to vector<8x128xbf16>
    %cst_42 = arith.constant dense<0.000000e+00> : vector<8x128xf32>
    %135 = tpu.matmul %134, %22, %cst_42 {dimension_numbers = #tpu.dot_dimension_numbers<[1], [0], [0], [1], [0, 0, 1, 1], [], []>} : vector<8x128xbf16>, vector<128x128xbf16>, vector<8x128xf32> -> vector<8x128xf32>
    %136 = arith.addf %133, %135 : vector<8x128xf32>
    %137 = arith.negf %136 : vector<8x128xf32>
    %138 = math.exp %137 : vector<8x128xf32>
    %cst_43 = arith.constant 1.000000e+00 : f32
    %139 = vector.broadcast %cst_43 : f32 to vector<8x128xf32>
    %140 = arith.addf %139, %138 : vector<8x128xf32>
    %141 = arith.divf %139, %140 : vector<8x128xf32>
    %142 = math.tanh %136 : vector<8x128xf32>
    %c96_i32_44 = arith.constant 96 : i32
    %143 = tpu.dynamic_rotate %141 by %c96_i32_44 dim 1 : vector<8x128xf32>, i32 -> vector<8x128xf32>
    %c64_i32_45 = arith.constant 64 : i32
    %144 = tpu.dynamic_rotate %142 by %c64_i32_45 dim 1 : vector<8x128xf32>, i32 -> vector<8x128xf32>
    %c32_i32_46 = arith.constant 32 : i32
    %145 = tpu.dynamic_rotate %141 by %c32_i32_46 dim 1 : vector<8x128xf32>, i32 -> vector<8x128xf32>
    %146 = arith.mulf %143, %130 : vector<8x128xf32>
    %147 = arith.mulf %141, %144 : vector<8x128xf32>
    %148 = arith.addf %146, %147 : vector<8x128xf32>
    %149 = math.tanh %148 : vector<8x128xf32>
    %150 = arith.mulf %145, %149 : vector<8x128xf32>
    %151 = vector.extract_strided_slice %20 {offsets = [56, 0], sizes = [8, 128], strides = [1, 1]} : vector<64x128xf32> to vector<8x128xf32>
    %152 = arith.truncf %150 : vector<8x128xf32> to vector<8x128xbf16>
    %cst_47 = arith.constant dense<0.000000e+00> : vector<8x128xf32>
    %153 = tpu.matmul %152, %22, %cst_47 {dimension_numbers = #tpu.dot_dimension_numbers<[1], [0], [0], [1], [0, 0, 1, 1], [], []>} : vector<8x128xbf16>, vector<128x128xbf16>, vector<8x128xf32> -> vector<8x128xf32>
    %154 = arith.addf %151, %153 : vector<8x128xf32>
    %155 = arith.negf %154 : vector<8x128xf32>
    %156 = math.exp %155 : vector<8x128xf32>
    %cst_48 = arith.constant 1.000000e+00 : f32
    %157 = vector.broadcast %cst_48 : f32 to vector<8x128xf32>
    %158 = arith.addf %157, %156 : vector<8x128xf32>
    %159 = arith.divf %157, %158 : vector<8x128xf32>
    %160 = math.tanh %154 : vector<8x128xf32>
    %c96_i32_49 = arith.constant 96 : i32
    %161 = tpu.dynamic_rotate %159 by %c96_i32_49 dim 1 : vector<8x128xf32>, i32 -> vector<8x128xf32>
    %c64_i32_50 = arith.constant 64 : i32
    %162 = tpu.dynamic_rotate %160 by %c64_i32_50 dim 1 : vector<8x128xf32>, i32 -> vector<8x128xf32>
    %c32_i32_51 = arith.constant 32 : i32
    %163 = tpu.dynamic_rotate %159 by %c32_i32_51 dim 1 : vector<8x128xf32>, i32 -> vector<8x128xf32>
    %164 = arith.mulf %161, %148 : vector<8x128xf32>
    %165 = arith.mulf %159, %162 : vector<8x128xf32>
    %166 = arith.addf %164, %165 : vector<8x128xf32>
    %167 = math.tanh %166 : vector<8x128xf32>
    %168 = arith.mulf %163, %167 : vector<8x128xf32>
    %c136 = arith.constant 136 : index
    %c0_52 = arith.constant 0 : index
    %169 = vector.load %arg1[%c136, %c0_52] : memref<264x128xf32, #tpu.memory_space<vmem>>, vector<128x128xf32>
    %170 = arith.truncf %169 : vector<128x128xf32> to vector<128x128xbf16>
    %171 = arith.truncf %168 : vector<8x128xf32> to vector<8x128xbf16>
    %cst_53 = arith.constant dense<0.000000e+00> : vector<8x128xf32>
    %172 = tpu.matmul %171, %170, %cst_53 {dimension_numbers = #tpu.dot_dimension_numbers<[1], [0], [0], [1], [0, 0, 1, 1], [], []>} : vector<8x128xbf16>, vector<128x128xbf16>, vector<8x128xf32> -> vector<8x128xf32>
    %173 = vector.broadcast %3 : vector<1x128xf32> to vector<8x128xf32>
    %174 = arith.addf %172, %173 : vector<8x128xf32>
    %cst_54 = arith.constant 0.000000e+00 : f32
    %175 = vector.broadcast %cst_54 : f32 to vector<8x128xf32>
    %176 = arith.maximumf %174, %175 : vector<8x128xf32>
    %177 = vector.broadcast %4 : vector<1x128xf32> to vector<8x128xf32>
    %178 = arith.mulf %176, %177 : vector<8x128xf32>
    %cst_55 = arith.constant dense<0.000000e+00> : vector<8xf32>
    %179 = vector.multi_reduction <add>, %178, %cst_55 [1] : vector<8x128xf32> to vector<8xf32>
    %180 = vector.shape_cast %179 : vector<8xf32> to vector<8x1xf32>
    %181 = vector.broadcast %180 : vector<8x1xf32> to vector<8x128xf32>
    %182 = vector.broadcast %5 : vector<1x128xf32> to vector<8x128xf32>
    %183 = arith.addf %181, %182 : vector<8x128xf32>
    %184 = arith.negf %183 : vector<8x128xf32>
    %185 = math.exp %184 : vector<8x128xf32>
    %cst_56 = arith.constant 1.000000e+00 : f32
    %186 = vector.broadcast %cst_56 : f32 to vector<8x128xf32>
    %187 = arith.addf %186, %185 : vector<8x128xf32>
    %188 = arith.divf %186, %187 : vector<8x128xf32>
    %c0_57 = arith.constant 0 : index
    %c0_58 = arith.constant 0 : index
    %189 = vector.load %arg3[%c0_57, %c0_58] : memref<8x128xf32, #tpu.memory_space<vmem>>, vector<8x128xf32>
    tpu.vector_store %arg3[%c0_57, %c0_58], %188 {strides = array<i32>} : memref<8x128xf32, #tpu.memory_space<vmem>>, vector<8x128xf32>,
    return
  }
}

</mosaic_0001>

<bundles_post_ra>
// kernel: tpu_custom_call.1
= control target key start
LH: loop header
LB: loop body
LE: loop exit
PB: predicated region body
PF: predicated region fallthrough
CT: control target
= control target key end

     0   :  { %8 = vsyncpa [#allocation3], 0  ;;  %s1814_s0 = inlined_call_operand.vmem [shape: f32[128,3], index: 0, kind: input, shape index: {}]   ;;  %s1815_s1 = inlined_call_operand.hbm [shape: f32[264,128], index: 1, kind: input, shape index: {}]   ;;  %s1816_s2 = inlined_call_operand.vmem [shape: f32[8,128], index: 2, kind: input, shape index: {}]   ;;  %s1817_s3 = inlined_call_operand.hbm [shape: f32[8,128], index: 3, kind: output, shape index: {}]  }
   0x1   :  { %9 = vsyncpa [#allocation4], 0  ;;  %s1458_s12 = smov [#allocation2]   ;;  %s1410_s16 = scalar_lea.hbm %s1815_s1, 4224 }
   0x2   :  { %s17_s13 = sshll.u32 %s1458_s12, 4  ;;  %p1411_p0 = scmp.ne.s32.totalorder %s1815_s1, %s1410_s16  ;;  %s18_s13 = int_to_ptr.vmem [resolvable:$true] %s17_s13 }
   0x3   :  { %p1414_p1 = scmp.lt.u32.totalorder %s1410_s16, %s1815_s1 }
   0x5   :  { %p1416_p2 = pnand %p1414_p1, %p1411_p0 }
   0x7   :  { %1419 = shalt.err (!%p1416_p2)
}
   0x8   :  { %s1420_s21 = scalar_lea.vmem %s18_s13, 4224  ;;  %p1425_p4 = scmp.lt.s32.totalorder %s18_s13, %s18_s13 }
   0x9   :  { %p1421_p3 = scmp.ne.s32.totalorder %s18_s13, %s1420_s21  ;;  %p1426_p5 = scmp.lt.s32.totalorder %s1420_s21, %s1420_s21 }
   0xb   :  { %p1427_p6 = por %p1426_p5, %p1425_p4 }
   0xd   :  { %p1428_p7 = pnand %p1427_p6, %p1421_p3 }
   0xf   :  { %1431 = shalt.err (!%p1428_p7)
}
  0x10   :  { %s1459_s22 = smov 128   ;;  %s1460_s23 = smov 8  }
  0x11   :  { %23 = dma.hbm_to_vmem [thread:$0]  %s1815_s1, 4224, %s18_s13, [#allocation3], %s1459_s22, %s1459_s22, %s1460_s23  }
  0x12   :  { %1454 = dma.done.wait [#allocation3], 4224  }
  0x13   :  { %1455 = vsyncadd [#allocation3], 4294963072  ;;  %vm105_vm0 = vcmask 1042432   ;;  %vm56_vm1 = vcmask 23552   ;;  %v30_v0 = vld [vmem:[%s1816_s2 + $0x4] sm:$0x7] }
  0x14   :  { %v36_v1 = vld [vmem:[%s1814_s0] sm:$0xff]  ;;  %v37_v2 = vld [vmem:[%s1814_s0 + $0x8] sm:$0xff]  ;;  %1115 = vmatprep.subr.msk.mxu0 %vm105_vm0, %v30_v0  ;;  %v38_v3 = vld [vmem:[%s1814_s0 + $0x10] sm:$0xff]  ;;  %v1461_v4 = vmov 0.0   ;;  %vm301_vm2 = vcmask 1043456   ;;  %vm1462_vm3 = vmmov 0  }
  0x15   :  { %1117 = vmatprep.mubr.msk.f32.mxu0 %vm56_vm1, %v36_v1  ;;  %1116 = vmatpush3.msk.msra.mxu0 %vm105_vm0, %v30_v0  ;;  %v39_v5 = vld [vmem:[%s1814_s0 + $0x18] sm:$0xff]  ;;  %v40_v6 = vld [vmem:[%s1814_s0 + $0x20] sm:$0xff]  ;;  %v370_v7 = vld [vmem:[#allocation2 + $0x8] sm:$0xff]  ;;  %v1463_v45 = vmov 0   ;;  %vm288_vm4 = vcmask 64512   ;;  %s1464_s7 = smov 32  }
  0x16   :  { %1118 = vmatmul.mubr.msk.f32.vlgmr.msra.gmra.mrb[0].mxu0 %vm56_vm1, %v37_v2  ;;  %1151 = vmatprep.subr.bf16.mxu0 %v1461_v4  ;;  %v371_v8 = vld [vmem:[#allocation2 + $0x10] sm:$0xff]  ;;  %v41_v10 = vld [vmem:[%s1814_s0 + $0x28] sm:$0xff]  ;;  %v42_v11 = vld [vmem:[%s1814_s0 + $0x30] sm:$0xff]  ;;  %s1465_s8 = smov 96   ;;  %s1466_s9 = smov 64  }
  0x17   :  { %1120 = vmatprep.mubr.msk.f32.mxu0 %vm56_vm1, %v38_v3  ;;  %v1523_v9 = vpack.c.bf16 %v371_v8, %v370_v7  ;;  %v43_v12 = vld [vmem:[%s1814_s0 + $0x38] sm:$0xff]  ;;  %v44_v13 = vld [vmem:[%s1814_s0 + $0x40] sm:$0xff]  ;;  %v45_v14 = vld [vmem:[%s1814_s0 + $0x48] sm:$0xff]  ;;  %s1467_s16 = smov [#allocation5]  }
  0x18   :  { %v46_v15 = vld [vmem:[%s1814_s0 + $0x50] sm:$0xff]  ;;  %v47_v16 = vld [vmem:[%s1814_s0 + $0x58] sm:$0xff]  ;;  %v48_v17 = vld [vmem:[%s1814_s0 + $0x60] sm:$0xff]  ;;  %s968_s17 = sshll.u32 %s1467_s16, 4  ;;  %s969_s17 = int_to_ptr.vmem [resolvable:$true] %s968_s17 }
  0x19   :  { %1152 = vmatpush3.bf16.msra.mxu0 %v1523_v9  ;;  %v49_v18 = vld [vmem:[%s1814_s0 + $0x68] sm:$0xff]  ;;  %v50_v19 = vld [vmem:[%s1814_s0 + $0x70] sm:$0xff]  ;;  %v51_v20 = vld [vmem:[%s1814_s0 + $0x78] sm:$0xff]  ;;  %s1432_s18 = scalar_lea.vmem %s969_s17, 128  ;;  %p1437_p9 = scmp.lt.s32.totalorder %s969_s17, %s969_s17 }
  0x1a   :  { %1121 = vmatmul.mubr.msk.f32.gmra.mrb[2].mxu0 %vm56_vm1, %v39_v5  ;;  %1153 = vmatprep.subr.bf16.mxu0 %v1461_v4  ;;  %v372_v21 = vld [vmem:[#allocation2 + $0x18] sm:$0xff]  ;;  %v373_v22 = vld [vmem:[#allocation2 + $0x20] sm:$0xff]  ;;  %v374_v24 = vld [vmem:[#allocation2 + $0x28] sm:$0xff]  ;;  %p1433_p8 = scmp.ne.s32.totalorder %s969_s17, %s1432_s18  ;;  %p1438_p10 = scmp.lt.s32.totalorder %s1432_s18, %s1432_s18 }
  0x1b   :  { %1123 = vmatprep.mubr.msk.f32.mxu0 %vm56_vm1, %v40_v6  ;;  %v1572_v23 = vpack.c.bf16 %v373_v22, %v372_v21  ;;  %v375_v25 = vld [vmem:[#allocation2 + $0x30] sm:$0xff]  ;;  %v376_v27 = vld [vmem:[#allocation2 + $0x38] sm:$0xff]  ;;  %v377_v28 = vld [vmem:[#allocation2 + $0x40] sm:$0xff] }
  0x1c   :  { %v1576_v26 = vpack.c.bf16 %v375_v25, %v374_v24  ;;  %v1580_v29 = vpack.c.bf16 %v377_v28, %v376_v27  ;;  %v378_v30 = vld [vmem:[#allocation2 + $0x48] sm:$0xff]  ;;  %v379_v31 = vld [vmem:[#allocation2 + $0x50] sm:$0xff]  ;;  %v380_v33 = vld [vmem:[#allocation2 + $0x58] sm:$0xff]  ;;  %p1439_p11 = por %p1438_p10, %p1437_p9 }
  0x1d   :  { %1154 = vmatpush3.bf16.msra.mxu0 %v1572_v23  ;;  %v1584_v32 = vpack.c.bf16 %v379_v31, %v378_v30  ;;  %v381_v34 = vld [vmem:[#allocation2 + $0x60] sm:$0xff]  ;;  %v382_v36 = vld [vmem:[#allocation2 + $0x68] sm:$0xff]  ;;  %v383_v37 = vld [vmem:[#allocation2 + $0x70] sm:$0xff] }
  0x1e   :  { %1124 = vmatmul.mubr.msk.f32.gmra.mrb[4].mxu0 %vm56_vm1, %v41_v10  ;;  %1155 = vmatprep.subr.bf16.mxu0 %v1461_v4  ;;  %v1588_v35 = vpack.c.bf16 %v381_v34, %v380_v33  ;;  %v1592_v38 = vpack.c.bf16 %v383_v37, %v382_v36  ;;  %v278_v39 = vld [vmem:[#allocation2] sm:$0xff]  ;;  %v384_v41 = vld [vmem:[#allocation2 + $0x78] sm:$0xff]  ;;  %p1440_p12 = pnand %p1439_p11, %p1433_p8 }
  0x1f   :  { %1126 = vmatprep.mubr.msk.f32.mxu0 %vm56_vm1, %v42_v11  ;;  %v279_v40 = vpack.c.bf16 %v278_v39, %v278_v39  ;;  %v385_v42 = vld [vmem:[#allocation2 + $0x80] sm:$0xff]  ;;  %v977_v52 = vld [vmem:[%s1816_s2 + $0x7] ss:$0 sm:$0xff] }
  0x20   :  { %v1596_v43 = vpack.c.bf16 %v385_v42, %v384_v41 }
  0x21   :  { %1156 = vmatpush3.bf16.msra.mxu0 %v1576_v26  ;;  %1331 = vmatprep.subr.msk.bf16.mxu1 %vm301_vm2, %v279_v40  ;;  %v303_v44 = vsel %vm301_vm2, %v279_v40, 0 }
  0x22   :  { %1127 = vmatmul.mubr.msk.f32.gmra.mrb[6].mxu0 %vm56_vm1, %v43_v12  ;;  %1157 = vmatprep.subr.bf16.mxu0 %v1461_v4 }
  0x23   :  { %1129 = vmatprep.mubr.msk.f32.mxu0 %vm56_vm1, %v44_v13  ;;  %1142 = vmatpush3.bf16.msra.mxu1 %v303_v44 }
  0x24   :  { %1171 = vmatprep.subr.bf16.mxu1 %v1461_v4 }
  0x25   :  { %1158 = vmatpush3.bf16.msra.mxu0 %v1580_v29 }
  0x26   :  { %1130 = vmatmul.mubr.msk.f32.gmra.mrb[8].mxu0 %vm56_vm1, %v45_v14  ;;  %1159 = vmatprep.subr.bf16.mxu0 %v1461_v4 }
  0x27   :  { %1132 = vmatprep.mubr.msk.f32.mxu0 %vm56_vm1, %v46_v15 }
  0x29   :  { %1160 = vmatpush3.bf16.msra.mxu0 %v1584_v32 }
  0x2a   :  { %1133 = vmatmul.mubr.msk.f32.gmra.mrb[10].mxu0 %vm56_vm1, %v47_v16  ;;  %1161 = vmatprep.subr.bf16.mxu0 %v1461_v4 }
  0x2b   :  { %1135 = vmatprep.mubr.msk.f32.mxu0 %vm56_vm1, %v48_v17 }
  0x2d   :  { %1162 = vmatpush3.bf16.msra.mxu0 %v1588_v35 }
  0x2e   :  { %1136 = vmatmul.mubr.msk.f32.gmra.mrb[12].mxu0 %vm56_vm1, %v49_v18  ;;  %1163 = vmatprep.subr.bf16.mxu0 %v1461_v4 }
  0x2f   :  { %1138 = vmatprep.mubr.msk.f32.mxu0 %vm56_vm1, %v50_v19 }
  0x31   :  { %1164 = vmatpush3.bf16.msra.mxu0 %v1592_v38 }
  0x32   :  { %1139 = vmatmul.mubr.msk.f32.gmra.mrb[14].mxu0 %vm56_vm1, %v51_v20  ;;  %1165 = vmatprep.subr.bf16.mxu0 %v1461_v4 }
  0x33   :  { %1167 = vmatprep.mubr.msk.bf16.mxu0 %vm1462_vm3, %v1461_v4 }
  0x35   :  { %1166 = vmatpush3.bf16.msra.mxu0 %v1596_v43 }
  0x36   :  { %1191 = vmatprep.subr.bf16.mxu0 %v1461_v4 }
  0x38   :  { %1168 = vmatmul.mubr.bf16.vlgmr.msra.gmra.mrb[16].mxu0 %v1463_v45 }
  0x39   :  { %1192 = vmatpush3.bf16.msra.mxu0 %v1523_v9  ;;  %1207 = vmatprep.mubr.msk.bf16.mxu0 %vm1462_vm3, %v1461_v4 }
  0x3a   :  { %1193 = vmatprep.subr.bf16.mxu0 %v1461_v4 }
  0x3d   :  { %1194 = vmatpush3.bf16.msra.mxu0 %v1572_v23 }
  0x3e   :  { %1195 = vmatprep.subr.bf16.mxu0 %v1461_v4 }
  0x41   :  { %1196 = vmatpush3.bf16.msra.mxu0 %v1576_v26 }
  0x42   :  { %1197 = vmatprep.subr.bf16.mxu0 %v1461_v4 }
  0x45   :  { %1198 = vmatpush3.bf16.msra.mxu0 %v1580_v29 }
  0x46   :  { %1199 = vmatprep.subr.bf16.mxu0 %v1461_v4 }
  0x49   :  { %1200 = vmatpush3.bf16.msra.mxu0 %v1584_v32 }
  0x4a   :  { %1201 = vmatprep.subr.bf16.mxu0 %v1461_v4 }
  0x4d   :  { %1202 = vmatpush3.bf16.msra.mxu0 %v1588_v35 }
  0x4e   :  { %1203 = vmatprep.subr.bf16.mxu0 %v1461_v4 }
  0x51   :  { %1204 = vmatpush3.bf16.msra.mxu0 %v1592_v38 }
  0x52   :  { %1205 = vmatprep.subr.bf16.mxu0 %v1461_v4 }
  0x55   :  { %1206 = vmatpush3.bf16.msra.mxu0 %v1596_v43 }
  0x56   :  { %1231 = vmatprep.subr.bf16.mxu0 %v1461_v4 }
  0xe9   :  { %v1119_v46 = vpop.f32.mrb[0].mxu0 }
  0xea   :  { %v175_v47 = vpop.f32.mrb[1].mxu0  ;;  %v181_v55 = vadd.f32 %v1119_v46, %v977_v52 }
  0xeb   :  { %v176_v56 = vadd.f32 %v977_v52, %v175_v47 }
  0xec   :  { %v255_v61 = vmax.f32 %v181_v55, 0.0 }
  0xed   :  { %v1122_v48 = vpop.f32.mrb[2].mxu0  ;;  %v254_v0 = vmax.f32 %v176_v56, 0.0  ;;  %v995_v56 = vld [vmem:[%s1816_s2] ss:$0 sm:$0xff] }
  0xee   :  { %v185_v49 = vpop.f32.mrb[3].mxu0  ;;  %v191_v62 = vadd.f32 %v1122_v48, %v977_v52 }
  0xef   :  { %v186_v1 = vadd.f32 %v977_v52, %v185_v49 }
  0xf0   :  { %v257_v11 = vmax.f32 %v191_v62, 0.0 }
  0xf1   :  { %v1125_v50 = vpop.f32.mrb[4].mxu0  ;;  %v256_v14 = vmax.f32 %v186_v1, 0.0 }
  0xf2   :  { %v195_v51 = vpop.f32.mrb[5].mxu0  ;;  %v201_v12 = vadd.f32 %v1125_v50, %v977_v52 }
  0xf3   :  { %v196_v15 = vadd.f32 %v977_v52, %v195_v51 }
  0xf4   :  { %v259_v25 = vmax.f32 %v201_v12, 0.0 }
  0xf5   :  { %v1128_v53 = vpop.f32.mrb[6].mxu0  ;;  %v258_v30 = vmax.f32 %v196_v15, 0.0 }
  0xf6   :  { %v205_v54 = vpop.f32.mrb[7].mxu0  ;;  %v211_v27 = vadd.f32 %v1128_v53, %v977_v52 }
  0xf7   :  { %v206_v31 = vadd.f32 %v977_v52, %v205_v54 }
  0xf8   :  { %v261_v44 = vmax.f32 %v211_v27, 0.0 }
  0xf9   :  { %v1131_v57 = vpop.f32.mrb[8].mxu0  ;;  %v260_v46 = vmax.f32 %v206_v31, 0.0 }
  0xfa   :  { %v221_v58 = vadd.f32 %v1131_v57, %v977_v52  ;;  %v215_v59 = vpop.f32.mrb[9].mxu0 }
  0xfb   :  { %v216_v60 = vadd.f32 %v977_v52, %v215_v59 }
  0xfc   :  { %v263_v63 = vmax.f32 %v221_v58, 0.0 }
  0xfd   :  { %v262_v2 = vmax.f32 %v216_v60, 0.0  ;;  %v1134_v3 = vpop.f32.mrb[10].mxu0 }
  0xfe   :  { %v271_v5 = vmax.f32 %v255_v61, %v263_v63  ;;  %v231_v6 = vadd.f32 %v1134_v3, %v977_v52  ;;  %v225_v7 = vpop.f32.mrb[11].mxu0 }
  0xff   :  { %v270_v8 = vmax.f32 %v254_v0, %v262_v2  ;;  %v226_v10 = vadd.f32 %v977_v52, %v225_v7 }
 0x100   :  { %v265_v13 = vmax.f32 %v231_v6, 0.0 }
 0x101   :  { %v264_v16 = vmax.f32 %v226_v10, 0.0  ;;  %v1137_v17 = vpop.f32.mrb[12].mxu0  ;;  %v280_v18 = vpack.c.bf16 %v271_v5, %v270_v8 }
 0x102   :  { %v273_v19 = vmax.f32 %v257_v11, %v265_v13  ;;  %v241_v20 = vadd.f32 %v1137_v17, %v977_v52  ;;  %v235_v21 = vpop.f32.mrb[13].mxu0 }
 0x103   :  { %v272_v22 = vmax.f32 %v256_v14, %v264_v16  ;;  %v236_v24 = vadd.f32 %v977_v52, %v235_v21  ;;  %1143 = vmatprep.mubr.msk.bf16.mxu1 %vm288_vm4, %v280_v18 }
 0x104   :  { %v267_v28 = vmax.f32 %v241_v20, 0.0 }
 0x105   :  { %v281_v33 = vpack.c.bf16 %v273_v19, %v272_v22  ;;  %v266_v34 = vmax.f32 %v236_v24, 0.0  ;;  %v1140_v36 = vpop.f32.mrb[14].mxu0 }
 0x106   :  { %v275_v37 = vmax.f32 %v259_v25, %v267_v28  ;;  %v251_v39 = vadd.f32 %v1140_v36, %v977_v52  ;;  %v245_v40 = vpop.f32.mrb[15].mxu0 }
 0x107   :  { %v274_v41 = vmax.f32 %v258_v30, %v266_v34  ;;  %v246_v42 = vadd.f32 %v977_v52, %v245_v40  ;;  %1144 = vmatmul.mubr.msk.bf16.vlgmr.msra.gmra.mrb[0].mxu1 %vm288_vm4, %v281_v33 }
 0x108   :  { %v269_v45 = vmax.f32 %v251_v39, 0.0  ;;  %1172 = vmatpush3.bf16.msra.mxu1 %v1523_v9 }
 0x109   :  { %v282_v47 = vpack.c.bf16 %v275_v37, %v274_v41  ;;  %v268_v48 = vmax.f32 %v246_v42, 0.0  ;;  %1173 = vmatprep.subr.bf16.mxu1 %v1461_v4 }
 0x10a   :  { %v277_v49 = vmax.f32 %v261_v44, %v269_v45 }
 0x10b   :  { %v276_v50 = vmax.f32 %v260_v46, %v268_v48  ;;  %1147 = vmatprep.mubr.msk.bf16.mxu1 %vm288_vm4, %v282_v47  ;;  %v428_v52 = vpop.f32.mrb[16].mxu0 }
 0x10c   :  { %1174 = vmatpush3.bf16.msra.mxu1 %v1572_v23  ;;  %v1169_v53 = vpop.f32.mrb[17].mxu0 }
 0x10d   :  { %v283_v51 = vpack.c.bf16 %v277_v49, %v276_v50  ;;  %1175 = vmatprep.subr.bf16.mxu1 %v1461_v4  ;;  %v431_v54 = vpop.f32.mrb[18].mxu0 }
 0x10e   :  { %v1170_v55 = vpop.f32.mrb[19].mxu0 }
 0x10f   :  { %1148 = vmatmul.mubr.msk.bf16.gmra.mrb[4].mxu1 %vm288_vm4, %v283_v51 }
 0x110   :  { %1176 = vmatpush3.bf16.msra.mxu1 %v1576_v26  ;;  %1187 = vmatprep.mubr.msk.bf16.mxu1 %vm1462_vm3, %v1461_v4 }
 0x111   :  { %1177 = vmatprep.subr.bf16.mxu1 %v1461_v4 }
 0x114   :  { %1178 = vmatpush3.bf16.msra.mxu1 %v1580_v29 }
 0x115   :  { %1179 = vmatprep.subr.bf16.mxu1 %v1461_v4 }
 0x118   :  { %1180 = vmatpush3.bf16.msra.mxu1 %v1584_v32 }
 0x119   :  { %1181 = vmatprep.subr.bf16.mxu1 %v1461_v4 }
 0x11c   :  { %1182 = vmatpush3.bf16.msra.mxu1 %v1588_v35 }
 0x11d   :  { %1183 = vmatprep.subr.bf16.mxu1 %v1461_v4 }
 0x120   :  { %1184 = vmatpush3.bf16.msra.mxu1 %v1592_v38 }
 0x121   :  { %1185 = vmatprep.subr.bf16.mxu1 %v1461_v4 }
 0x124   :  { %1186 = vmatpush3.bf16.msra.mxu1 %v1596_v43 }
 0x125   :  { %1211 = vmatprep.subr.bf16.mxu1 %v1461_v4 }
 0x1da   :  { %v1145_v57 = vpop.f32.mrb[0].mxu1 }
 0x1db   :  { %v1649_v58 = vadd.f32 %v1145_v57, %v995_v56  ;;  %v339_v59 = vpop.f32.mrb[1].mxu1 }
 0x1dc   :  { %v340_v60 = vadd.f32 %v995_v56, %v339_v59  ;;  %v1146_v61 = vpop.f32.mrb[2].mxu1 }
 0x1dd   :  { %v1651_v62 = vadd.f32 %v1146_v61, %v995_v56  ;;  %v342_v63 = vpop.f32.mrb[3].mxu1 }
 0x1de   :  { %v434_v0 = vadd.f32 %v428_v52, %v340_v60  ;;  %v343_v1 = vadd.f32 %v995_v56, %v342_v63 }
 0x1e0   :  { %v1000_v2 = vmul.f32 -1.442695, %v434_v0 }
 0x1e2   :  { %1342 = vpow2.f32 %v1000_v2  ;;  %v1149_v3 = vpop.f32.mrb[4].mxu1 }
 0x1e3   :  { %v1653_v5 = vadd.f32 %v1149_v3, %v995_v56  ;;  %v355_v6 = vpop.f32.mrb[5].mxu1 }
 0x1e4   :  { %v1655_v7 = vadd.f32 %v995_v56, %v355_v6  ;;  %v1150_v8 = vpop.f32.mrb[6].mxu1 }
 0x1e5   :  { %v1657_v10 = vadd.f32 %v1150_v8, %v995_v56  ;;  %v358_v11 = vpop.f32.mrb[7].mxu1 }
 0x1e6   :  { %v1659_v12 = vadd.f32 %v995_v56, %v358_v11 }
 0x1ec   :  { %v1343_v13 = vpop.eup %1342 }
 0x1ed   :  { %v438_v14 = vadd.f32 1.0, %v1343_v13 }
 0x1ef   :  { %1344 = vrcp.f32 %v438_v14 }
 0x1f0   :  { %1346 = vtanh.f32 %v434_v0 }
 0x1f9   :  { %v1345_v15 = vpop.eup %1344 }
 0x1fa   :  { %446 = vrot.lane.b32.xlu1 %v1345_v15, %s1464_s7  ;;  %442 = vrot.lane.b32.xlu0 %v1345_v15, %s1465_s8  ;;  %v1347_v16 = vpop.eup %1346 }
 0x1fe   :  { %444 = vrot.lane.b32.xlu0 %v1347_v16, %s1466_s9 }
 0x26c   :  { %v443_v17 = vpop.permute.xlu0 %442  ;;  %v447_v24 = vpop.permute.xlu1 %446 }
 0x26d   :  { %v448_v19 = vmul.f32 0.0, %v443_v17 }
 0x270   :  { %v445_v18 = vpop.permute.xlu0 %444 }
 0x271   :  { %v449_v20 = vmul.f32 %v1345_v15, %v445_v18 }
 0x273   :  { %v450_v21 = vadd.f32 %v449_v20, %v448_v19 }
 0x275   :  { %1348 = vtanh.f32 %v450_v21 }
 0x27f   :  { %v1349_v22 = vpop.eup %1348 }
 0x280   :  { %v452_v25 = vmul.f32 %v1349_v22, %v447_v24 }
 0x282   :  { %v453_v27 = vpack.c.bf16 %v452_v25, %v452_v25 }
 0x284   :  { %1188 = vmatmul.mubr.bf16.vlgmr.msra.gmra.mrb[8].mxu1 %v453_v27 }
 0x285   :  { %1212 = vmatpush3.bf16.msra.mxu1 %v1523_v9  ;;  %1227 = vmatprep.mubr.msk.bf16.mxu1 %vm1462_vm3, %v1461_v4 }
 0x286   :  { %1213 = vmatprep.subr.bf16.mxu1 %v1461_v4 }
 0x289   :  { %1214 = vmatpush3.bf16.msra.mxu1 %v1572_v23 }
 0x28a   :  { %1215 = vmatprep.subr.bf16.mxu1 %v1461_v4 }
 0x28d   :  { %1216 = vmatpush3.bf16.msra.mxu1 %v1576_v26 }
 0x28e   :  { %1217 = vmatprep.subr.bf16.mxu1 %v1461_v4 }
 0x291   :  { %1218 = vmatpush3.bf16.msra.mxu1 %v1580_v29 }
 0x292   :  { %1219 = vmatprep.subr.bf16.mxu1 %v1461_v4 }
 0x295   :  { %1220 = vmatpush3.bf16.msra.mxu1 %v1584_v32 }
 0x296   :  { %1221 = vmatprep.subr.bf16.mxu1 %v1461_v4 }
 0x299   :  { %1222 = vmatpush3.bf16.msra.mxu1 %v1588_v35 }
 0x29a   :  { %1223 = vmatprep.subr.bf16.mxu1 %v1461_v4 }
 0x29d   :  { %1224 = vmatpush3.bf16.msra.mxu1 %v1592_v38 }
 0x29e   :  { %1225 = vmatprep.subr.bf16.mxu1 %v1461_v4 }
 0x2a1   :  { %1226 = vmatpush3.bf16.msra.mxu1 %v1596_v43 }
 0x2a2   :  { %1251 = vmatprep.subr.bf16.mxu1 %v1461_v4 }
 0x357   :  { %v488_v28 = vpop.f32.mrb[8].mxu1 }
 0x358   :  { %v494_v30 = vadd.f32 %v488_v28, %v343_v1  ;;  %v1189_v31 = vpop.f32.mrb[9].mxu1 }
 0x359   :  { %v491_v33 = vpop.f32.mrb[10].mxu1 }
 0x35a   :  { %v1001_v34 = vmul.f32 -1.442695, %v494_v30  ;;  %1350 = vtanh.f32 %v494_v30  ;;  %v1190_v36 = vpop.f32.mrb[11].mxu1 }
 0x35c   :  { %1352 = vpow2.f32 %v1001_v34 }
 0x364   :  { %v1351_v37 = vpop.eup %1350 }
 0x365   :  { %504 = vrot.lane.b32.xlu0 %v1351_v37, %s1466_s9 }
 0x366   :  { %v1353_v39 = vpop.eup %1352 }
 0x367   :  { %v498_v40 = vadd.f32 1.0, %v1353_v39 }
 0x369   :  { %1354 = vrcp.f32 %v498_v40 }
 0x373   :  { %v1355_v41 = vpop.eup %1354 }
 0x374   :  { %502 = vrot.lane.b32.xlu1 %v1355_v41, %s1465_s8 }
 0x378   :  { %506 = vrot.lane.b32.xlu1 %v1355_v41, %s1464_s7 }
 0x3d7   :  { %v505_v42 = vpop.permute.xlu0 %504 }
 0x3d8   :  { %v509_v45 = vmul.f32 %v1355_v41, %v505_v42 }
 0x3e6   :  { %v503_v44 = vpop.permute.xlu1 %502 }
 0x3e7   :  { %v508_v46 = vmul.f32 %v503_v44, %v450_v21 }
 0x3e9   :  { %v510_v47 = vadd.f32 %v509_v45, %v508_v46 }
 0x3ea   :  { %v507_v49 = vpop.permute.xlu1 %506 }
 0x3eb   :  { %1356 = vtanh.f32 %v510_v47 }
 0x3f5   :  { %v1357_v48 = vpop.eup %1356 }
 0x3f6   :  { %v512_v50 = vmul.f32 %v1357_v48, %v507_v49 }
 0x3f8   :  { %v513_v51 = vpack.c.bf16 %v512_v50, %v512_v50 }
 0x3fa   :  { %1208 = vmatmul.mubr.bf16.vlgmr.msra.gmra.mrb[20].mxu0 %v513_v51 }
 0x3fb   :  { %1232 = vmatpush3.bf16.msra.mxu0 %v1523_v9  ;;  %1247 = vmatprep.mubr.msk.bf16.mxu0 %vm1462_vm3, %v1461_v4 }
 0x3fc   :  { %1233 = vmatprep.subr.bf16.mxu0 %v1461_v4 }
 0x3ff   :  { %1234 = vmatpush3.bf16.msra.mxu0 %v1572_v23 }
 0x400   :  { %1235 = vmatprep.subr.bf16.mxu0 %v1461_v4 }
 0x403   :  { %1236 = vmatpush3.bf16.msra.mxu0 %v1576_v26 }
 0x404   :  { %1237 = vmatprep.subr.bf16.mxu0 %v1461_v4 }
 0x407   :  { %1238 = vmatpush3.bf16.msra.mxu0 %v1580_v29 }
 0x408   :  { %1239 = vmatprep.subr.bf16.mxu0 %v1461_v4 }
 0x40b   :  { %1240 = vmatpush3.bf16.msra.mxu0 %v1584_v32 }
 0x40c   :  { %1241 = vmatprep.subr.bf16.mxu0 %v1461_v4 }
 0x40f   :  { %1242 = vmatpush3.bf16.msra.mxu0 %v1588_v35 }
 0x410   :  { %1243 = vmatprep.subr.bf16.mxu0 %v1461_v4 }
 0x413   :  { %1244 = vmatpush3.bf16.msra.mxu0 %v1592_v38 }
 0x414   :  { %1245 = vmatprep.subr.bf16.mxu0 %v1461_v4 }
 0x417   :  { %1246 = vmatpush3.bf16.msra.mxu0 %v1596_v43 }
 0x418   :  { %1271 = vmatprep.subr.bf16.mxu0 %v1461_v4 }
 0x4cd   :  { %v548_v52 = vpop.f32.mrb[20].mxu0 }
 0x4ce   :  { %v554_v53 = vadd.f32 %v548_v52, %v1649_v58  ;;  %v1209_v54 = vpop.f32.mrb[21].mxu0 }
 0x4cf   :  { %v551_v55 = vpop.f32.mrb[22].mxu0 }
 0x4d0   :  { %v1002_v56 = vmul.f32 -1.442695, %v554_v53  ;;  %1358 = vtanh.f32 %v554_v53  ;;  %v1210_v57 = vpop.f32.mrb[23].mxu0 }
 0x4d2   :  { %1360 = vpow2.f32 %v1002_v56 }
 0x4da   :  { %v1359_v59 = vpop.eup %1358 }
 0x4db   :  { %564 = vrot.lane.b32.xlu1 %v1359_v59, %s1466_s9 }
 0x4dc   :  { %v1361_v60 = vpop.eup %1360 }
 0x4dd   :  { %v558_v61 = vadd.f32 1.0, %v1361_v60 }
 0x4df   :  { %1362 = vrcp.f32 %v558_v61 }
 0x4e9   :  { %v1363_v63 = vpop.eup %1362 }
 0x4ea   :  { %562 = vrot.lane.b32.xlu0 %v1363_v63, %s1465_s8 }
 0x4ee   :  { %566 = vrot.lane.b32.xlu0 %v1363_v63, %s1464_s7 }
 0x54d   :  { %v565_v0 = vpop.permute.xlu1 %564 }
 0x54e   :  { %v569_v58 = vmul.f32 %v1363_v63, %v565_v0 }
 0x55c   :  { %v563_v1 = vpop.permute.xlu0 %562 }
 0x55d   :  { %v568_v2 = vmul.f32 %v563_v1, %v510_v47 }
 0x55f   :  { %v570_v3 = vadd.f32 %v569_v58, %v568_v2 }
 0x560   :  { %v567_v8 = vpop.permute.xlu0 %566 }
 0x561   :  { %1364 = vtanh.f32 %v570_v3 }
 0x56b   :  { %v1365_v6 = vpop.eup %1364 }
 0x56c   :  { %v572_v11 = vmul.f32 %v1365_v6, %v567_v8 }
 0x56e   :  { %v573_v13 = vpack.c.bf16 %v572_v11, %v572_v11 }
 0x570   :  { %1228 = vmatmul.mubr.bf16.vlgmr.msra.gmra.mrb[12].mxu1 %v573_v13 }
 0x571   :  { %1252 = vmatpush3.bf16.msra.mxu1 %v1523_v9  ;;  %1267 = vmatprep.mubr.msk.bf16.mxu1 %vm1462_vm3, %v1461_v4 }
 0x572   :  { %1253 = vmatprep.subr.bf16.mxu1 %v1461_v4 }
 0x575   :  { %1254 = vmatpush3.bf16.msra.mxu1 %v1572_v23 }
 0x576   :  { %1255 = vmatprep.subr.bf16.mxu1 %v1461_v4 }
 0x579   :  { %1256 = vmatpush3.bf16.msra.mxu1 %v1576_v26 }
 0x57a   :  { %1257 = vmatprep.subr.bf16.mxu1 %v1461_v4 }
 0x57d   :  { %1258 = vmatpush3.bf16.msra.mxu1 %v1580_v29 }
 0x57e   :  { %1259 = vmatprep.subr.bf16.mxu1 %v1461_v4 }
 0x581   :  { %1260 = vmatpush3.bf16.msra.mxu1 %v1584_v32 }
 0x582   :  { %1261 = vmatprep.subr.bf16.mxu1 %v1461_v4 }
 0x585   :  { %1262 = vmatpush3.bf16.msra.mxu1 %v1588_v35 }
 0x586   :  { %1263 = vmatprep.subr.bf16.mxu1 %v1461_v4 }
 0x589   :  { %1264 = vmatpush3.bf16.msra.mxu1 %v1592_v38 }
 0x58a   :  { %1265 = vmatprep.subr.bf16.mxu1 %v1461_v4 }
 0x58d   :  { %1266 = vmatpush3.bf16.msra.mxu1 %v1596_v43 }
 0x58e   :  { %1291 = vmatprep.subr.bf16.mxu1 %v1461_v4 }
 0x643   :  { %v608_v14 = vpop.f32.mrb[12].mxu1 }
 0x644   :  { %v614_v15 = vadd.f32 %v608_v14, %v1651_v62  ;;  %v1229_v16 = vpop.f32.mrb[13].mxu1 }
 0x645   :  { %v611_v17 = vpop.f32.mrb[14].mxu1 }
 0x646   :  { %v1003_v18 = vmul.f32 -1.442695, %v614_v15  ;;  %1366 = vtanh.f32 %v614_v15  ;;  %v1230_v19 = vpop.f32.mrb[15].mxu1 }
 0x648   :  { %1368 = vpow2.f32 %v1003_v18 }
 0x650   :  { %v1367_v20 = vpop.eup %1366 }
 0x651   :  { %624 = vrot.lane.b32.xlu0 %v1367_v20, %s1466_s9 }
 0x652   :  { %v1369_v21 = vpop.eup %1368 }
 0x653   :  { %v618_v22 = vadd.f32 1.0, %v1369_v21 }
 0x655   :  { %1370 = vrcp.f32 %v618_v22 }
 0x65f   :  { %v1371_v24 = vpop.eup %1370 }
 0x660   :  { %622 = vrot.lane.b32.xlu1 %v1371_v24, %s1465_s8 }
 0x664   :  { %626 = vrot.lane.b32.xlu1 %v1371_v24, %s1464_s7 }
 0x6c3   :  { %v625_v25 = vpop.permute.xlu0 %624 }
 0x6c4   :  { %v629_v62 = vmul.f32 %v1371_v24, %v625_v25 }
 0x6d2   :  { %v623_v27 = vpop.permute.xlu1 %622 }
 0x6d3   :  { %v628_v28 = vmul.f32 %v623_v27, %v570_v3 }
 0x6d5   :  { %v630_v30 = vadd.f32 %v629_v62, %v628_v28 }
 0x6d6   :  { %v627_v33 = vpop.permute.xlu1 %626 }
 0x6d7   :  { %1372 = vtanh.f32 %v630_v30 }
 0x6e1   :  { %v1373_v31 = vpop.eup %1372 }
 0x6e2   :  { %v632_v34 = vmul.f32 %v1373_v31, %v627_v33 }
 0x6e4   :  { %v633_v36 = vpack.c.bf16 %v632_v34, %v632_v34  ;;  %v873_v34 = vld [vmem:[#allocation2 + $0x88] sm:$0xff] }
 0x6e6   :  { %1248 = vmatmul.mubr.bf16.vlgmr.msra.gmra.mrb[24].mxu0 %v633_v36  ;;  %v874_v36 = vld [vmem:[#allocation2 + $0x90] sm:$0xff] }
 0x6e7   :  { %1272 = vmatpush3.bf16.msra.mxu0 %v1523_v9  ;;  %1287 = vmatprep.mubr.msk.bf16.mxu0 %vm1462_vm3, %v1461_v4 }
 0x6e8   :  { %1273 = vmatprep.subr.bf16.mxu0 %v1461_v4 }
 0x6eb   :  { %1274 = vmatpush3.bf16.msra.mxu0 %v1572_v23 }
 0x6ec   :  { %1275 = vmatprep.subr.bf16.mxu0 %v1461_v4 }
 0x6ef   :  { %1276 = vmatpush3.bf16.msra.mxu0 %v1576_v26 }
 0x6f0   :  { %1277 = vmatprep.subr.bf16.mxu0 %v1461_v4 }
 0x6f3   :  { %1278 = vmatpush3.bf16.msra.mxu0 %v1580_v29 }
 0x6f4   :  { %1279 = vmatprep.subr.bf16.mxu0 %v1461_v4 }
 0x6f7   :  { %1280 = vmatpush3.bf16.msra.mxu0 %v1584_v32 }
 0x6f8   :  { %1281 = vmatprep.subr.bf16.mxu0 %v1461_v4 }
 0x6fb   :  { %1282 = vmatpush3.bf16.msra.mxu0 %v1588_v35 }
 0x6fc   :  { %1283 = vmatprep.subr.bf16.mxu0 %v1461_v4 }
 0x6ff   :  { %1284 = vmatpush3.bf16.msra.mxu0 %v1592_v38 }
 0x700   :  { %1285 = vmatprep.subr.bf16.mxu0 %v1461_v4 }
 0x703   :  { %1286 = vmatpush3.bf16.msra.mxu0 %v1596_v43 }
 0x704   :  { %1311 = vmatprep.subr.bf16.mxu0 %v1461_v4 }
 0x7b9   :  { %v668_v37 = vpop.f32.mrb[24].mxu0 }
 0x7ba   :  { %v674_v39 = vadd.f32 %v668_v37, %v1655_v7  ;;  %v1249_v40 = vpop.f32.mrb[25].mxu0  ;;  %v875_v37 = vld [vmem:[#allocation2 + $0x98] sm:$0xff] }
 0x7bb   :  { %v671_v41 = vpop.f32.mrb[26].mxu0  ;;  %v889_v40 = vpack.c.bf16 %v874_v36, %v873_v34 }
 0x7bc   :  { %v1004_v42 = vmul.f32 -1.442695, %v674_v39  ;;  %1374 = vtanh.f32 %v674_v39  ;;  %v1250_v44 = vpop.f32.mrb[27].mxu0  ;;  %v876_v41 = vld [vmem:[#allocation2 + $0xa0] sm:$0xff] }
 0x7be   :  { %1376 = vpow2.f32 %v1004_v42 }
 0x7c6   :  { %v1375_v45 = vpop.eup %1374 }
 0x7c7   :  { %684 = vrot.lane.b32.xlu1 %v1375_v45, %s1466_s9  ;;  %v890_v45 = vpack.c.bf16 %v876_v41, %v875_v37 }
 0x7c8   :  { %v1377_v46 = vpop.eup %1376 }
 0x7c9   :  { %v678_v47 = vadd.f32 1.0, %v1377_v46  ;;  %v877_v46 = vld [vmem:[#allocation2 + $0xa8] sm:$0xff] }
 0x7cb   :  { %1378 = vrcp.f32 %v678_v47  ;;  %v878_v47 = vld [vmem:[#allocation2 + $0xb0] sm:$0xff] }
 0x7d5   :  { %v1379_v48 = vpop.eup %1378 }
 0x7d6   :  { %682 = vrot.lane.b32.xlu0 %v1379_v48, %s1465_s8 }
 0x7da   :  { %686 = vrot.lane.b32.xlu0 %v1379_v48, %s1464_s7 }
 0x839   :  { %v685_v49 = vpop.permute.xlu1 %684 }
 0x83a   :  { %v689_v7 = vmul.f32 %v1379_v48, %v685_v49  ;;  %v891_v48 = vpack.c.bf16 %v878_v47, %v877_v46  ;;  %v879_v49 = vld [vmem:[#allocation2 + $0xb8] sm:$0xff] }
 0x848   :  { %v683_v50 = vpop.permute.xlu0 %682 }
 0x849   :  { %v688_v51 = vmul.f32 %v683_v50, %v630_v30  ;;  %v880_v50 = vld [vmem:[#allocation2 + $0xc0] sm:$0xff] }
 0x84b   :  { %v690_v52 = vadd.f32 %v689_v7, %v688_v51  ;;  %v892_v7 = vpack.c.bf16 %v880_v50, %v879_v49 }
 0x84c   :  { %v687_v54 = vpop.permute.xlu0 %686 }
 0x84d   :  { %1380 = vtanh.f32 %v690_v52 }
 0x857   :  { %v1381_v53 = vpop.eup %1380 }
 0x858   :  { %v692_v55 = vmul.f32 %v1381_v53, %v687_v54  ;;  %v881_v53 = vld [vmem:[#allocation2 + $0xc8] sm:$0xff]  ;;  %v882_v54 = vld [vmem:[#allocation2 + $0xd0] sm:$0xff] }
 0x85a   :  { %v693_v56 = vpack.c.bf16 %v692_v55, %v692_v55  ;;  %v893_v55 = vpack.c.bf16 %v882_v54, %v881_v53 }
 0x85c   :  { %1268 = vmatmul.mubr.bf16.vlgmr.msra.gmra.mrb[16].mxu1 %v693_v56  ;;  %v883_v56 = vld [vmem:[#allocation2 + $0xd8] sm:$0xff] }
 0x85d   :  { %1292 = vmatpush3.bf16.msra.mxu1 %v1523_v9  ;;  %1307 = vmatprep.mubr.msk.bf16.mxu1 %vm1462_vm3, %v1461_v4 }
 0x85e   :  { %1293 = vmatprep.subr.bf16.mxu1 %v1461_v4 }
 0x861   :  { %1294 = vmatpush3.bf16.msra.mxu1 %v1572_v23 }
 0x862   :  { %1295 = vmatprep.subr.bf16.mxu1 %v1461_v4 }
 0x865   :  { %1296 = vmatpush3.bf16.msra.mxu1 %v1576_v26 }
 0x866   :  { %1297 = vmatprep.subr.bf16.mxu1 %v1461_v4 }
 0x869   :  { %1298 = vmatpush3.bf16.msra.mxu1 %v1580_v29 }
 0x86a   :  { %1299 = vmatprep.subr.bf16.mxu1 %v1461_v4 }
 0x86d   :  { %1300 = vmatpush3.bf16.msra.mxu1 %v1584_v32 }
 0x86e   :  { %1301 = vmatprep.subr.bf16.mxu1 %v1461_v4 }
 0x871   :  { %1302 = vmatpush3.bf16.msra.mxu1 %v1588_v35 }
 0x872   :  { %1303 = vmatprep.subr.bf16.mxu1 %v1461_v4 }
 0x875   :  { %1304 = vmatpush3.bf16.msra.mxu1 %v1592_v38 }
 0x876   :  { %1305 = vmatprep.subr.bf16.mxu1 %v1461_v4 }
 0x879   :  { %1306 = vmatpush3.bf16.msra.mxu1 %v1596_v43 }
 0x92f   :  { %v728_v9 = vpop.f32.mrb[16].mxu1 }
 0x930   :  { %v734_v23 = vadd.f32 %v728_v9, %v1659_v12  ;;  %v1269_v26 = vpop.f32.mrb[17].mxu1  ;;  %v884_v9 = vld [vmem:[#allocation2 + $0xe0] sm:$0xff] }
 0x931   :  { %v731_v29 = vpop.f32.mrb[18].mxu1  ;;  %v885_v26 = vld [vmem:[#allocation2 + $0xe8] sm:$0xff] }
 0x932   :  { %v1005_v57 = vmul.f32 -1.442695, %v734_v23  ;;  %1382 = vtanh.f32 %v734_v23  ;;  %v1270_v32 = vpop.f32.mrb[19].mxu1  ;;  %v894_v23 = vpack.c.bf16 %v884_v9, %v883_v56  ;;  %v886_v29 = vld [vmem:[#allocation2 + $0xf0] sm:$0xff] }
 0x934   :  { %1384 = vpow2.f32 %v1005_v57  ;;  %v895_v57 = vpack.c.bf16 %v886_v29, %v885_v26 }
 0x93c   :  { %v1383_v59 = vpop.eup %1382 }
 0x93d   :  { %744 = vrot.lane.b32.xlu0 %v1383_v59, %s1466_s9  ;;  %v887_v59 = vld [vmem:[#allocation2 + $0xf8] sm:$0xff] }
 0x93e   :  { %v1385_v35 = vpop.eup %1384 }
 0x93f   :  { %v738_v60 = vadd.f32 1.0, %v1385_v35  ;;  %v888_v35 = vld [vmem:[#allocation2 + $0x100] sm:$0xff] }
 0x941   :  { %1386 = vrcp.f32 %v738_v60  ;;  %v896_v60 = vpack.c.bf16 %v888_v35, %v887_v59 }
 0x94b   :  { %v1387_v38 = vpop.eup %1386 }
 0x94c   :  { %742 = vrot.lane.b32.xlu1 %v1387_v38, %s1465_s8 }
 0x950   :  { %746 = vrot.lane.b32.xlu1 %v1387_v38, %s1464_s7 }
 0x9af   :  { %v745_v43 = vpop.permute.xlu0 %744 }
 0x9b0   :  { %v749_v12 = vmul.f32 %v1387_v38, %v745_v43 }
 0x9be   :  { %v743_v61 = vpop.permute.xlu1 %742 }
 0x9bf   :  { %v748_v63 = vmul.f32 %v743_v61, %v690_v52 }
 0x9c1   :  { %v750_v0 = vadd.f32 %v749_v12, %v748_v63 }
 0x9c2   :  { %v747_v58 = vpop.permute.xlu1 %746 }
 0x9c3   :  { %1388 = vtanh.f32 %v750_v0 }
 0x9cd   :  { %v1389_v1 = vpop.eup %1388 }
 0x9ce   :  { %v752_v2 = vmul.f32 %v1389_v1, %v747_v58 }
 0x9d0   :  { %v753_v3 = vpack.c.bf16 %v752_v2, %v752_v2 }
 0x9d2   :  { %1288 = vmatmul.mubr.bf16.vlgmr.msra.gmra.mrb[28].mxu0 %v753_v3 }
 0x9d3   :  { %1327 = vmatprep.mubr.msk.bf16.mxu0 %vm1462_vm3, %v1461_v4  ;;  %1312 = vmatpush3.bf16.msra.mxu0 %v889_v40 }
 0x9d4   :  { %1313 = vmatprep.subr.bf16.mxu0 %v1461_v4 }
 0x9d7   :  { %1314 = vmatpush3.bf16.msra.mxu0 %v890_v45 }
 0x9d8   :  { %1315 = vmatprep.subr.bf16.mxu0 %v1461_v4 }
 0x9db   :  { %1316 = vmatpush3.bf16.msra.mxu0 %v891_v48 }
 0x9dc   :  { %1317 = vmatprep.subr.bf16.mxu0 %v1461_v4 }
 0x9df   :  { %1318 = vmatpush3.bf16.msra.mxu0 %v892_v7 }
 0x9e0   :  { %1319 = vmatprep.subr.bf16.mxu0 %v1461_v4 }
 0x9e3   :  { %1320 = vmatpush3.bf16.msra.mxu0 %v893_v55 }
 0x9e4   :  { %1321 = vmatprep.subr.bf16.mxu0 %v1461_v4 }
 0x9e7   :  { %1322 = vmatpush3.bf16.msra.mxu0 %v894_v23 }
 0x9e8   :  { %1323 = vmatprep.subr.bf16.mxu0 %v1461_v4 }
 0x9eb   :  { %1324 = vmatpush3.bf16.msra.mxu0 %v895_v57 }
 0x9ec   :  { %1325 = vmatprep.subr.bf16.mxu0 %v1461_v4  ;;  %v1008_v4 = vld [vmem:[%s1816_s2 + $0x1] ss:$0 sm:$0xff] }
 0x9ef   :  { %1326 = vmatpush3.bf16.msra.mxu0 %v896_v60 }
 0xaa5   :  { %v788_v6 = vpop.f32.mrb[28].mxu0 }
 0xaa6   :  { %v794_v8 = vadd.f32 %v788_v6, %v1653_v5  ;;  %v1289_v11 = vpop.f32.mrb[29].mxu0 }
 0xaa7   :  { %v791_v13 = vpop.f32.mrb[30].mxu0 }
 0xaa8   :  { %v1006_v14 = vmul.f32 -1.442695, %v794_v8  ;;  %1390 = vtanh.f32 %v794_v8  ;;  %v1290_v15 = vpop.f32.mrb[31].mxu0  ;;  %v1009_v13 = vld [vmem:[%s1816_s2 + $0x2] ss:$0 sm:$0xff] }
 0xaaa   :  { %1392 = vpow2.f32 %v1006_v14 }
 0xab2   :  { %v1391_v16 = vpop.eup %1390 }
 0xab3   :  { %804 = vrot.lane.b32.xlu1 %v1391_v16, %s1466_s9 }
 0xab4   :  { %v1393_v17 = vpop.eup %1392 }
 0xab5   :  { %v798_v18 = vadd.f32 1.0, %v1393_v17  ;;  %v1010_v17 = vld [vmem:[%s1816_s2 + $0x3] ss:$0 sm:$0xff] }
 0xab7   :  { %1394 = vrcp.f32 %v798_v18 }
 0xac1   :  { %v1395_v19 = vpop.eup %1394 }
 0xac2   :  { %802 = vrot.lane.b32.xlu0 %v1395_v19, %s1465_s8 }
 0xac6   :  { %806 = vrot.lane.b32.xlu0 %v1395_v19, %s1464_s7 }
 0xb25   :  { %v805_v20 = vpop.permute.xlu1 %804 }
 0xb26   :  { %v809_v5 = vmul.f32 %v1395_v19, %v805_v20 }
 0xb34   :  { %v803_v21 = vpop.permute.xlu0 %802 }
 0xb35   :  { %v808_v22 = vmul.f32 %v803_v21, %v750_v0 }
 0xb37   :  { %v1778_v24 = vadd.f32 %v809_v5, %v808_v22 }
 0xb38   :  { %v807_v27 = vpop.permute.xlu0 %806 }
 0xb39   :  { %1396 = vtanh.f32 %v1778_v24 }
 0xb43   :  { %v1397_v25 = vpop.eup %1396 }
 0xb44   :  { %v812_v62 = vmul.f32 %v1397_v25, %v807_v27 }
 0xb46   :  { %v813_v28 = vpack.c.bf16 %v812_v62, %v812_v62 }
 0xb48   :  { %1308 = vmatmul.mubr.bf16.vlgmr.msra.gmra.mrb[20].mxu1 %v813_v28 }
 0xc1b   :  { %v848_v30 = vpop.f32.mrb[20].mxu1 }
 0xc1c   :  { %v854_v31 = vadd.f32 %v848_v30, %v1657_v10  ;;  %v1309_v33 = vpop.f32.mrb[21].mxu1 }
 0xc1d   :  { %v851_v39 = vpop.f32.mrb[22].mxu1 }
 0xc1e   :  { %v1007_v42 = vmul.f32 -1.442695, %v854_v31  ;;  %1398 = vtanh.f32 %v854_v31  ;;  %v1310_v44 = vpop.f32.mrb[23].mxu1 }
 0xc20   :  { %1400 = vpow2.f32 %v1007_v42 }
 0xc28   :  { %v1399_v10 = vpop.eup %1398 }
 0xc29   :  { %864 = vrot.lane.b32.xlu0 %v1399_v10, %s1466_s9 }
 0xc2a   :  { %v1401_v51 = vpop.eup %1400 }
 0xc2b   :  { %v858_v52 = vadd.f32 1.0, %v1401_v51 }
 0xc2d   :  { %1402 = vrcp.f32 %v858_v52 }
 0xc37   :  { %v1403_v32 = vpop.eup %1402 }
 0xc38   :  { %862 = vrot.lane.b32.xlu1 %v1403_v32, %s1465_s8 }
 0xc3c   :  { %866 = vrot.lane.b32.xlu1 %v1403_v32, %s1464_s7 }
 0xc9b   :  { %v865_v38 = vpop.permute.xlu0 %864 }
 0xc9c   :  { %v869_v61 = vmul.f32 %v1403_v32, %v865_v38 }
 0xcaa   :  { %v863_v43 = vpop.permute.xlu1 %862 }
 0xcab   :  { %v868_v12 = vmul.f32 %v863_v43, %v1778_v24 }
 0xcad   :  { %v870_v63 = vadd.f32 %v869_v61, %v868_v12 }
 0xcae   :  { %v867_v1 = vpop.permute.xlu1 %866 }
 0xcaf   :  { %1404 = vtanh.f32 %v870_v63 }
 0xcb9   :  { %v1405_v0 = vpop.eup %1404 }
 0xcba   :  { %v872_v58 = vmul.f32 %v1405_v0, %v867_v1 }
 0xcbc   :  { %v897_v2 = vpack.c.bf16 %v872_v58, %v872_v58 }
 0xcbe   :  { %1328 = vmatmul.mubr.bf16.vlgmr.msra.gmra.mrb[32].mxu0 %v897_v2 }
 0xd91   :  { %v936_v3 = vpop.f32.mrb[32].mxu0 }
 0xd92   :  { %v937_v6 = vadd.f32 %v1008_v4, %v936_v3  ;;  %v1329_v8 = vpop.f32.mrb[33].mxu0 }
 0xd93   :  { %v939_v11 = vpop.f32.mrb[34].mxu0 }
 0xd94   :  { %v942_v14 = vmax.f32 %v937_v6, 0.0  ;;  %v1330_v15 = vpop.f32.mrb[35].mxu0 }
 0xd96   :  { %v947_v16 = vmul.f32 %v1009_v13, %v942_v14 }
 0xd98   :  { %948 = vadd.xlane.f32.xlu0 %v947_v16 }
 0xe25   :  { %v949_v18 = vpop.xlane.xlu0 %948 }
 0xe26   :  { %v954_v19 = vadd.f32 %v1010_v17, %v949_v18 }
 0xe28   :  { %v1011_v20 = vmul.f32 -1.442695, %v954_v19 }
 0xe2a   :  { %1406 = vpow2.f32 %v1011_v20 }
 0xe34   :  { %v1407_v21 = vpop.eup %1406 }
 0xe35   :  { %v958_v5 = vadd.f32 1.0, %v1407_v21 }
 0xe37   :  { %1408 = vrcp.f32 %v958_v5 }
 0xe41   :  { %v1409_v22 = vpop.eup %1408 }
 0xe42   :  { %961 = vst [vmem:[#allocation5] sm:$0xff] %v1409_v22 }
 0xe43   :  { %1443 = shalt.err (!%p1440_p12)
}
 0xe44   :  { %s1444_s20 = scalar_lea.hbm %s1817_s3, 128 }
 0xe45   :  { %p1445_p13 = scmp.ne.s32.totalorder %s1817_s3, %s1444_s20  ;;  %p1448_p0 = scmp.lt.u32.totalorder %s1444_s20, %s1817_s3 }
 0xe47   :  { %p1450_p1 = pnand %p1448_p0, %p1445_p13 }
 0xe49   :  { %1453 = shalt.err (!%p1450_p1)
}
 0xe4a   :  { %971 = dma.vmem_to_hbm [thread:$0]  %s969_s17, 128, %s1817_s3, [#allocation4]  }
 0xe4b   :  { %1456 = dma.done.wait [#allocation4], 128  }
 0xe4c   :  { %1457 = vsyncadd [#allocation4], 4294967168 }
 0xe4d   :  { %975 = vsyncpa [#allocation3], 1 }
 0xe4e   :  { %976 = vsyncpa [#allocation4], 1 }

</bundles_post_ra>
